<compile_context>
chip_gen: v7x
topology: tpu7x:2x2x1
jax: 0.10.0
libtpu: 0.0.40
codegen_flags: <defaults>
</compile_context>

<pallas_src>
import jax
import jax.numpy as jnp
from jax.experimental import pallas as pl
from jax.experimental.pallas import tpu as pltpu


def _round_up(x, m):
    return ((x + m - 1) // m) * m


def _kd_row_kernel(beta_ref, s_ref, t_ref, out_ref):
    """Per-row KL(softmax(t*beta) || softmax(s*beta)), summed over the bin axis.

    s_ref, t_ref: (TM, L) tiles of student / teacher logits (any float dtype).
    out_ref:      (TM, 1) per-row KL loss (f32).
    """
    beta = beta_ref[0, 0]
    s = s_ref[...].astype(jnp.float32) * beta
    t = t_ref[...].astype(jnp.float32) * beta

    # Student log-softmax along the bin axis (numerically stable).
    s_shift = s - jnp.max(s, axis=-1, keepdims=True)
    s_lse = jnp.log(jnp.sum(jnp.exp(s_shift), axis=-1, keepdims=True))
    log_p_s = s_shift - s_lse                                      # (TM, L)

    # Teacher: only exp(t - max) and its row sum are needed.
    t_shift = t - jnp.max(t, axis=-1, keepdims=True)
    t_exp = jnp.exp(t_shift)                                       # (TM, L)
    t_sum = jnp.sum(t_exp, axis=-1, keepdims=True)                 # (TM, 1)

    # KLDivLoss(reduction='none') with prob target / log-prob input, summed
    # over bins:  sum p_t*(log p_t - log p_s)
    #           = (1/t_sum) * sum t_exp*(t_shift - log_p_s) - log(t_sum).
    inner = jnp.sum(t_exp * (t_shift - log_p_s), axis=-1, keepdims=True)
    # Per-row (TM, 1) scalars only; exact reciprocal here costs ~1 vreg of work.
    out_ref[...] = inner * pl.reciprocal(t_sum, approx=False) - jnp.log(t_sum)


def _choose_tile_rows(M, L):
    """Largest multiple-of-8 row tile whose f32 working tile is ~2 MiB.

    With ~4-6 live (TM, L) f32 block temporaries plus double-buffered inputs
    this keeps total VMEM well inside the 32 MiB scoped limit requested below
    (and inside v7x's 64 MiB physical VMEM).
    """
    if M < 8:
        return M                          # tiny case: full (untiled) row dim
    max_tile_bytes = 2 * 1024 * 1024
    tm = max_tile_bytes // (L * 4)
    tm = max(8, min(1024, (tm // 8) * 8))
    tm = min(tm, (M // 8) * 8)            # never exceed the row count
    # Keep >= 2 grid steps when there is enough work so the v7x megacore can
    # shard the (parallel) row axis across both TensorCores.
    if M <= tm and M >= 16:
        tm = max(8, _round_up((M + 1) // 2, 8))
    return tm


def _kd_row_loss(logit_s, logit_t, beta, *, max_rows_per_tile=None):
    """Per-row summed KL loss, shape (M, 1), for flattened (M, L) logits."""
    assert logit_s.shape == logit_t.shape
    M, L = logit_s.shape
    tm = _choose_tile_rows(M, L)
    if max_rows_per_tile is not None:       # testing hook (multiple of 8)
        tm = min(tm, max_rows_per_tile)
    grid = pl.cdiv(M, tm)
    beta_arr = jnp.asarray(beta, dtype=jnp.float32).reshape(1, 1)

    # Output is (M, 1): < 0.5% of the input HBM traffic, so the masked (TM, 1)
    # stores are nowhere near the binding slot; kept column-shaped so the
    # BlockSpec trivially satisfies the (8, 128) tiling rule.
    return pl.pallas_call(
        _kd_row_kernel,
        out_shape=jax.ShapeDtypeStruct((M, 1), jnp.float32),
        grid=(grid,),
        in_specs=[
            pl.BlockSpec(memory_space=pltpu.MemorySpace.SMEM),   # beta scalar
            pl.BlockSpec((tm, L), lambda i: (i, 0)),             # student
            pl.BlockSpec((tm, L), lambda i: (i, 0)),             # teacher
        ],
        out_specs=pl.BlockSpec((tm, 1), lambda i: (i, 0)),
        compiler_params=pltpu.CompilerParams(
            dimension_semantics=("parallel",),
            vmem_limit_bytes=32 * 1024 * 1024,
        ),
    )(beta_arr, logit_s, logit_t)


def _kd_single_loss(logit_s, logit_t, beta, target_weight, weight):
    """Mirror of KDLoss.loss().

    Note: target_weight is accepted but unused, exactly as in the PyTorch
    reference implementation.
    """
    N, K, L = logit_s.shape
    row = _kd_row_loss(logit_s.reshape(N * K, L),
                       logit_t.reshape(N * K, L), beta)          # (N*K, 1)
    loss_all = row.reshape(N, K).sum(axis=1).mean()
    return weight * loss_all


def kd_loss_forward(pred, pred_t, beta, target_weight, weight=1.0):
    """Mirror of KDLoss.forward().

    Inputs may be f32 or bf16; the kernel upcasts internally, so passing bf16
    logits halves HBM read traffic for this bandwidth-bound kernel.
    """
    ls_x, ls_y = pred
    lt_x, lt_y = pred_t
    lt_x = jax.lax.stop_gradient(lt_x)   # .detach()
    lt_y = jax.lax.stop_gradient(lt_y)
    num_joints = ls_x.shape[1]
    # TODO(synk): fuse the x and y passes into one pallas_call (common padded L
    #             or a 2-entry leading grid axis) to amortize launch cost.
    # TODO(synk): add a custom_vjp (grad = weight*beta/(N*num_joints) *
    #             (softmax(s*beta) - softmax(t*beta))) before using this as a
    #             training loss; pallas_call is not differentiable by itself.
    loss = _kd_single_loss(ls_x, lt_x, beta, target_weight, weight)
    loss = loss + _kd_single_loss(ls_y, lt_y, beta, target_weight, weight)
    return loss / num_joints


def _reference(pred, pred_t, beta, weight=1.0):
    """Pure-JAX reference (f32 compute) for sanity checking."""
    def one(ls, lt):
        N, K, L = ls.shape
        ls = ls.astype(jnp.float32).reshape(N * K, L)
        lt = lt.astype(jnp.float32).reshape(N * K, L)
        s = jax.nn.log_softmax(ls * beta, axis=1)
        t = jax.nn.softmax(lt * beta, axis=1)
        log_t = jax.nn.log_softmax(lt * beta, axis=1)
        kl = t * (log_t - s)
        return weight * kl.sum(axis=1).reshape(N, K).sum(axis=1).mean()
    K = pred[0].shape[1]
    return (one(pred[0], pred_t[0]) + one(pred[1], pred_t[1])) / K


if __name__ == "__main__":
    key = jax.random.PRNGKey(0)

    # ---- Test 1: forward loss, K=5 so M = N*K = 10 (not a multiple of 8),
    # exercising the ragged last grid block + masked output writes. ----------
    N, K, Lx, Ly = 2, 5, 256, 128
    k1, k2, k3, k4, k5, k6 = jax.random.split(key, 6)
    ls_x = jax.random.normal(k1, (N, K, Lx), dtype=jnp.float32)
    ls_y = jax.random.normal(k2, (N, K, Ly), dtype=jnp.float32)
    lt_x = jax.random.normal(k3, (N, K, Lx), dtype=jnp.float32)
    lt_y = jax.random.normal(k4, (N, K, Ly), dtype=jnp.float32)
    target_weight = jnp.ones((N, K), dtype=jnp.float32)  # unused, as in PyTorch
    beta, weight = 2.0, 1.0

    loss = kd_loss_forward((ls_x, ls_y), (lt_x, lt_y), beta, target_weight, weight)
    loss = jax.block_until_ready(loss)
    ref = _reference((ls_x, ls_y), (lt_x, lt_y), beta, weight)
    assert jnp.allclose(loss, ref, rtol=1e-5, atol=1e-5), (loss, ref)

    # ---- Test 2: per-row kernel, multi-tile grid with a larger tile and a
    # ragged last block (M = 51, TM = 48). -----------------------------------
    N2, K2, L2 = 3, 17, 128
    s2 = jax.random.normal(k5, (N2 * K2, L2), dtype=jnp.float32)
    t2 = jax.random.normal(k6, (N2 * K2, L2), dtype=jnp.float32)
    row = jax.block_until_ready(_kd_row_loss(s2, t2, beta))
    s_ref = jax.nn.log_softmax(s2 * beta, axis=1)
    t_ref = jax.nn.softmax(t2 * beta, axis=1)
    row_ref = (t_ref * (jnp.log(t_ref) - s_ref)).sum(axis=1, keepdims=True)
    assert jnp.allclose(row, row_ref, rtol=1e-4, atol=1e-5), (row, row_ref)

    # ---- Test 3: bf16 inputs (halved HBM traffic); compare against the f32
    # reference evaluated on the same bf16-quantized logits. -----------------
    pred_bf16 = (ls_x.astype(jnp.bfloat16), ls_y.astype(jnp.bfloat16))
    pred_t_bf16 = (lt_x.astype(jnp.bfloat16), lt_y.astype(jnp.bfloat16))
    loss_bf16 = kd_loss_forward(pred_bf16, pred_t_bf16, beta, target_weight, weight)
    loss_bf16 = jax.block_until_ready(loss_bf16)
    ref_bf16 = _reference(pred_bf16, pred_t_bf16, beta, weight)
    assert jnp.allclose(loss_bf16, ref_bf16, rtol=1e-4, atol=1e-4), (loss_bf16, ref_bf16)

    print("KERNEL_OK")
</pallas_src>

<mosaic_0001>
module attributes {stable_mosaic.version = 11 : i64} {
  func.func @_kd_row_kernel(%arg0: i32, %arg1: memref<1x1xf32, #tpu.memory_space<smem>>, %arg2: memref<8x256xf32, #tpu.memory_space<vmem>>, %arg3: memref<8x256xf32, #tpu.memory_space<vmem>>, %arg4: memref<8x1xf32, #tpu.memory_space<vmem>>) attributes {dimension_semantics = [#tpu.dimension_semantics<parallel>], iteration_bounds = array<i64: 2>, scalar_prefetch = 0 : i64, scratch_operands = 0 : i64, tpu.core_type = #tpu.core_type<tc>, window_params = [{transform_indices = @transform_0, window_bounds = array<i64: 1, 1>}, {transform_indices = @transform_1, window_bounds = array<i64: 8, 256>}, {transform_indices = @transform_2, window_bounds = array<i64: 8, 256>}, {transform_indices = @transform_3, window_bounds = array<i64: 8, 1>}]} {
    %c0 = arith.constant 0 : index
    %c0_0 = arith.constant 0 : index
    %0 = memref.load %arg1[%c0, %c0_0] : memref<1x1xf32, #tpu.memory_space<smem>>
    %c0_1 = arith.constant 0 : index
    %c0_2 = arith.constant 0 : index
    %1 = vector.load %arg2[%c0_1, %c0_2] : memref<8x256xf32, #tpu.memory_space<vmem>>, vector<8x256xf32>
    %2 = vector.broadcast %0 : f32 to vector<8x256xf32>
    %3 = arith.mulf %1, %2 : vector<8x256xf32>
    %c0_3 = arith.constant 0 : index
    %c0_4 = arith.constant 0 : index
    %4 = vector.load %arg3[%c0_3, %c0_4] : memref<8x256xf32, #tpu.memory_space<vmem>>, vector<8x256xf32>
    %5 = vector.broadcast %0 : f32 to vector<8x256xf32>
    %6 = arith.mulf %4, %5 : vector<8x256xf32>
    %cst = arith.constant dense<0xFF800000> : vector<8xf32>
    %7 = vector.multi_reduction <maximumf>, %3, %cst [1] : vector<8x256xf32> to vector<8xf32>
    %8 = vector.shape_cast %7 : vector<8xf32> to vector<8x1xf32>
    %9 = vector.broadcast %8 : vector<8x1xf32> to vector<8x256xf32>
    %10 = arith.subf %3, %9 : vector<8x256xf32>
    %11 = math.exp %10 : vector<8x256xf32>
    %cst_5 = arith.constant dense<0.000000e+00> : vector<8xf32>
    %12 = vector.multi_reduction <add>, %11, %cst_5 [1] : vector<8x256xf32> to vector<8xf32>
    %13 = vector.shape_cast %12 : vector<8xf32> to vector<8x1xf32>
    %14 = math.log %13 : vector<8x1xf32>
    %15 = vector.broadcast %14 : vector<8x1xf32> to vector<8x256xf32>
    %16 = arith.subf %10, %15 : vector<8x256xf32>
    %cst_6 = arith.constant dense<0xFF800000> : vector<8xf32>
    %17 = vector.multi_reduction <maximumf>, %6, %cst_6 [1] : vector<8x256xf32> to vector<8xf32>
    %18 = vector.shape_cast %17 : vector<8xf32> to vector<8x1xf32>
    %19 = vector.broadcast %18 : vector<8x1xf32> to vector<8x256xf32>
    %20 = arith.subf %6, %19 : vector<8x256xf32>
    %21 = math.exp %20 : vector<8x256xf32>
    %cst_7 = arith.constant dense<0.000000e+00> : vector<8xf32>
    %22 = vector.multi_reduction <add>, %21, %cst_7 [1] : vector<8x256xf32> to vector<8xf32>
    %23 = vector.shape_cast %22 : vector<8xf32> to vector<8x1xf32>
    %24 = arith.subf %20, %16 : vector<8x256xf32>
    %25 = arith.mulf %21, %24 : vector<8x256xf32>
    %cst_8 = arith.constant dense<0.000000e+00> : vector<8xf32>
    %26 = vector.multi_reduction <add>, %25, %cst_8 [1] : vector<8x256xf32> to vector<8xf32>
    %27 = vector.shape_cast %26 : vector<8xf32> to vector<8x1xf32>
    %28 = tpu.reciprocal %23 : vector<8x1xf32> -> vector<8x1xf32>
    %29 = arith.mulf %27, %28 : vector<8x1xf32>
    %30 = math.log %23 : vector<8x1xf32>
    %31 = arith.subf %29, %30 : vector<8x1xf32>
    %c0_9 = arith.constant 0 : index
    %c0_10 = arith.constant 0 : index
    %32 = vector.load %arg4[%c0_9, %c0_10] : memref<8x1xf32, #tpu.memory_space<vmem>>, vector<8x1xf32>
    tpu.vector_store %arg4[%c0_9, %c0_10], %31 {strides = array<i32>} : memref<8x1xf32, #tpu.memory_space<vmem>>, vector<8x1xf32>,
    return
  }
  func.func @transform_0(%arg0: i32) -> (i32, i32) {
    %c0_i32 = arith.constant 0 : i32
    %c0_i32_0 = arith.constant 0 : i32
    %c0_i32_1 = arith.constant 0 : i32
    return %c0_i32, %c0_i32_0 : i32, i32
  }
  func.func @transform_1(%arg0: i32) -> (i32, i32) {
    %c0_i32 = arith.constant 0 : i32
    %c0_i32_0 = arith.constant 0 : i32
    return %arg0, %c0_i32 : i32, i32
  }
  func.func @transform_2(%arg0: i32) -> (i32, i32) {
    %c0_i32 = arith.constant 0 : i32
    %c0_i32_0 = arith.constant 0 : i32
    return %arg0, %c0_i32 : i32, i32
  }
  func.func @transform_3(%arg0: i32) -> (i32, i32) {
    %c0_i32 = arith.constant 0 : i32
    %c0_i32_0 = arith.constant 0 : i32
    return %arg0, %c0_i32 : i32, i32
  }
}

</mosaic_0001>

<bundles_post_ra>
// kernel: tpu_custom_call.1
= control target key start
LH: loop header
LB: loop body
LE: loop exit
PB: predicated region body
PF: predicated region fallthrough
CT: control target
= control target key end

     0   :  { %s720_s0 = inlined_call_operand.<no memory space> [shape: f32[1,1], index: 0, kind: input, shape index: {}]   ;;  %s721_s1 = inlined_call_operand.hbm [shape: f32[10,256], index: 1, kind: input, shape index: {}]   ;;  %s722_s2 = inlined_call_operand.hbm [shape: f32[10,256], index: 2, kind: input, shape index: {}]   ;;  %s723_s3 = inlined_call_operand.vmem [shape: f32[10,1], index: 3, kind: output, shape index: {}]  }
   0x1   :  { %8 = sst [smem:[#allocation2]] %s720_s0 }
   0x2   :  { %9 = vsyncpa [#allocation4], 0 }
   0x3   :  { %11 = vsyncpa [#allocation4 + $0x1], 0 }
   0x4   :  { %12 = vsyncpa [#allocation6], 0 }
   0x5   :  { %14 = vsyncpa [#allocation6 + $0x1], 0  ;;  %s566_s14 = smov 0   ;;  %s568_s15 = smov 0  }
   0x6   :  { %s570_s16 = smov 0   ;;  %s572_s17 = smov 0  }
   0x7 LB: > { %s585_s0 = sadd.s32 4294967295, %s539_s17   ;;  %s588_s18 = sadd.s32 1, %s539_s17   ;;  %s539_s17 = sphi %s572_s17, %s735_s17   ;;  %s535_s16 = sphi %s570_s16, %s734_s16   ;;  %s531_s15 = sphi %s568_s15, %s733_s15   ;;  %s527_s14 = sphi %s566_s14, %s732_s14  }
   0x8   : > { %s45_s19 = ssub.s32 %s539_s17, %s588_s18  ;;  %s48_s20 = sadd.s32 1, %s535_s16 }
   0x9   : > { %p46_p0 = scmp.eq.s32.totalorder %s45_s19, 0  ;;  %p55_p1 = scmp.ne.s32.totalorder %s535_s16, %s531_s15 }
   0xa   : > { %p56_p2 = scmp.eq.s32.totalorder %s539_s17, 0  ;;  %p61_p3 = scmp.ne.s32.totalorder %s531_s15, %s527_s14 }
   0xb   : > { %s598_s21 = scalar_select %p46_p0, %s535_s16, %s48_s20  }
   0xc   : > { %p57_p4 = por %p56_p2, %p55_p1  ;;  %p62_p5 = scmp.eq.s32.totalorder %s585_s0, 0 }
   0xd   : > { %p394_p6 = scmp.lt.s32.totalorder %s539_s17, 2  ;;  %s607_s23 = sand.u32 1, %s535_s16  }
   0xe   : > { %p602_p7 = por %p62_p5, %p61_p3  ;;  %s369_s24 = sshll.u32 %s607_s23, 4 }
   0xf   : > { %s381_s25 = sshll.u32 %s539_s17, 8  ;;  %s144_s29 = scalar_lea.vmem [#allocation3], %s369_s24 }
  0x10   : > { %s725_s22 = scalar_select %p602_p7, 1, 0 }
  0x11   : > { %s616_s28 = scalar_lea.hbm %s721_s1, %s381_s25  ;;  %s152_s30 = sshll.u32 %s144_s29, 4  ;;  %s620_s30 = int_to_ptr.vmem [resolvable:$true] %s152_s30 }
  0x12   : > { %p622_p8 = pnand %p394_p6, %p57_p4  ;;  %s141_s5 = scalar_lea.sflag [#allocation4], %s607_s23 }
  0x13   : > { %s441_s6 = scalar_lea.hbm %s616_s28, 256  ;;  %s446_s9 = scalar_lea.hbm %s721_s1, 512 }
  0x14   : > { %p442_p11 = scmp.ne.s32.totalorder %s616_s28, %s441_s6  ;;  %p443_p12 = pneg %p622_p8 }
  0x15   : > { %p447_p1 = scmp.lt.u32.totalorder %s616_s28, %s721_s1  ;;  %p448_p2 = scmp.lt.u32.totalorder %s446_s9, %s441_s6 }
  0x16   : > { %p444_p13 = pnand %p443_p12, %p442_p11  ;;  %p450_p4 = scmp.lt.u32.totalorder %s441_s6, %s616_s28 }
  0x17   : > { %p449_p3 = por %p448_p2, %p447_p1 }
  0x18   : > { %p445_p0 = pneg %p444_p13 }
  0x19   : > { %p451_p5 = por %p450_p4, %p449_p3 }
  0x1b   : > { %p452_p6 = pnand %p451_p5, %p445_p0 }
  0x1d   : > { %455 = shalt.err (!%p452_p6)
}
  0x1e   : > { %s456_s12 = scalar_lea.vmem %s620_s30, 256  ;;  %s541_s13 = smov [#allocation3]  }
  0x1f   : > { %p457_p11 = scmp.ne.s32.totalorder %s620_s30, %s456_s12  ;;  %s461_s14 = sshll.u32 %s541_s13, 4  ;;  %s462_s14 = int_to_ptr.vmem [resolvable:$false] %s461_s14 }
  0x20   : > { %s463_s19 = scalar_lea.vmem %s462_s14, 512  ;;  %p464_p10 = scmp.lt.s32.totalorder %s620_s30, %s462_s14 }
  0x21   : > { %p459_p13 = pnand %p457_p11, %p443_p12  ;;  %p465_p1 = scmp.lt.s32.totalorder %s463_s19, %s456_s12 }
  0x23   : > { %p460_p9 = pneg %p459_p13  ;;  %p466_p2 = por %p465_p1, %p464_p10 }
  0x25   : > { %p467_p3 = pnand %p466_p2, %p460_p9 }
  0x27   : > { %470 = shalt.err (!%p467_p3)
}
  0x28   : > { %390 = dma.hbm_to_vmem [thread:$0]  (!%p622_p8), %s616_s28, 256, %s620_s30, %s141_s5  }
  0x29   : > { %p727_p0 = scmp.lt.s32.totalorder %s539_s17, 3  ;;  %p728_p4 = scmp.ge.s32.totalorder %s539_s17, 1 }
  0x2a   : > { %s667_s29 = scalar_lea.hbm %s722_s2, %s381_s25  ;;  %s163_s6 = scalar_lea.vmem [#allocation5], %s369_s24 }
  0x2b   : > { %p658_p5 = pnand %p728_p4, %p727_p0  ;;  %s171_s7 = sshll.u32 %s163_s6, 4  ;;  %s172_s7 = int_to_ptr.vmem [resolvable:$true] %s171_s7 }
  0x2c   : > { %s160_s28 = scalar_lea.sflag [#allocation6], %s607_s23  ;;  %s471_s30 = scalar_lea.hbm %s667_s29, 256 }
  0x2d   : > { %s729_s20 = scalar_select %p658_p5, 1, 0 }
  0x2e   : > { %p472_p9 = scmp.ne.s32.totalorder %s667_s29, %s471_s30  ;;  %s476_s25 = scalar_lea.hbm %s722_s2, 512 }
  0x2f   : > { %p477_p11 = scmp.lt.u32.totalorder %s667_s29, %s722_s2  ;;  %p478_p13 = scmp.lt.u32.totalorder %s476_s25, %s471_s30 }
  0x30   : > { %p474_p10 = pnand %p472_p9, %p443_p12  ;;  %p480_p2 = scmp.lt.u32.totalorder %s471_s30, %s667_s29 }
  0x31   : > { %p479_p1 = por %p478_p13, %p477_p11 }
  0x32   : > { %p475_p6 = pneg %p474_p10 }
  0x33   : > { %p481_p3 = por %p480_p2, %p479_p1 }
  0x35   : > { %p482_p0 = pnand %p481_p3, %p475_p6 }
  0x37   : > { %485 = shalt.err (!%p482_p0)
}
  0x38   : > { %s486_s23 = scalar_lea.vmem %s172_s7, 256  ;;  %s542_s24 = smov [#allocation5]  }
  0x39   : > { %p487_p4 = scmp.ne.s32.totalorder %s172_s7, %s486_s23  ;;  %s491_s10 = sshll.u32 %s542_s24, 4  ;;  %s492_s10 = int_to_ptr.vmem [resolvable:$false] %s491_s10 }
  0x3a   : > { %s493_s11 = scalar_lea.vmem %s492_s10, 512  ;;  %p494_p7 = scmp.lt.s32.totalorder %s172_s7, %s492_s10 }
  0x3b   : > { %p489_p9 = pnand %p487_p4, %p443_p12  ;;  %p495_p5 = scmp.lt.s32.totalorder %s493_s11, %s486_s23 }
  0x3d   : > { %p490_p10 = pneg %p489_p9  ;;  %p496_p11 = por %p495_p5, %p494_p7 }
  0x3f   : > { %p497_p13 = pnand %p496_p11, %p490_p10 }
  0x41   : > { %500 = shalt.err (!%p497_p13)
}
  0x42   : > { %393 = dma.hbm_to_vmem [thread:$0]  (!%p622_p8), %s667_s29, 256, %s172_s7, %s160_s28  }
  0x43   : > { %p730_p6 = scmp.ne.s32.totalorder %s729_s20, 0 }
  0x44   : > { %s182_s12 = sand.u32 (!%p730_p6), 1, %s531_s15   ;;  %p731_p12 = scmp.ne.s32.totalorder (!%p730_p6), %s725_s22, 0 }
  0x45   : > { %180 = sbr.rel (%p730_p6) target bundleno = 560 (0x230), region = 32  ;;  %s376_s13 = sshll.u32 (!%p730_p6), %s182_s12, 4 }
  0x46   : > { %s183_s14 = scalar_lea.sflag (!%p730_p6), [#allocation4], %s182_s12  ;;  %s186_s19 = scalar_lea.vmem (!%p730_p6), [#allocation3], %s376_s13 }
  0x4c   : > { %518 = dma.done.wait (%p731_p12), %s183_s14, 256  }
  0x4d   : > { %520 = vsyncadd (%p731_p12), %s183_s14, 4294967040  ;;  %s192_s26 = scalar_lea.sflag [#allocation6], %s182_s12  ;;  %s195_s27 = scalar_lea.vmem [#allocation5], %s376_s13 }
  0x4e   : > { %522 = dma.done.wait (%p731_p12), %s192_s26, 256  }
  0x4f   : > { %524 = vsyncadd (%p731_p12), %s192_s26, 4294967040  ;;  %s226_s4 = sld [smem:[#allocation2]]  ;;  %v227_v0 = vld [vmem:[%s186_s19] sm:$0xff]  ;;  %v228_v1 = vld [vmem:[%s186_s19 + $0x8] sm:$0xff]  ;;  %p222_p7 = scmp.lt.s32.totalorder %s585_s0, 1  ;;  %vm276_vm0 = vcmask 7168  }
  0x50   : > { %v232_v6 = vld [vmem:[%s195_s27] sm:$0xff]  ;;  %v233_v7 = vld [vmem:[%s195_s27 + $0x8] sm:$0xff] }
  0x51   : > { %s737_s0 = smov (!%p222_p7, %s585_s0), 1 }
  0x52   : > { %s378_s22 = sshll.u32 %s737_s0, 3 }
  0x53   : > { %s225_s6 = scalar_lea.vmem %s723_s3, %s378_s22 }
  0x55   : > { %v229_v2 = vstv %s226_s4 }
  0x56   : > { %v230_v3 = vmul.f32 %v229_v2, %v227_v0  ;;  %v231_v4 = vmul.f32 %v229_v2, %v228_v1  ;;  %v234_v8 = vmul.f32 %v232_v6, %v229_v2  ;;  %v235_v9 = vmul.f32 %v233_v7, %v229_v2 }
  0x58   : > { %v236_v5 = vmax.f32 %v230_v3, %v231_v4  ;;  %v252_v10 = vmax.f32 %v234_v8, %v235_v9 }
  0x5a   : > { %237 = vmax.xlane.f32.xlu0 %v236_v5 }
  0x5e   : > { %253 = vmax.xlane.f32.xlu0 %v252_v10 }
  0xe7   : > { %v238_v11 = vpop.xlane.xlu0 %237 }
  0xe8   : > { %v239_v12 = vsub.f32 %v230_v3, %v238_v11  ;;  %v240_v13 = vsub.f32 %v231_v4, %v238_v11 }
  0xea   : > { %v241_v14 = vmul.f32 1.442695, %v239_v12  ;;  %v243_v15 = vmul.f32 1.442695, %v240_v13 }
  0xeb   : > { %v254_v19 = vpop.xlane.xlu0 %253 }
  0xec   : > { %427 = vpow2.f32 %v241_v14  ;;  %v255_v20 = vsub.f32 %v234_v8, %v254_v19  ;;  %v256_v21 = vsub.f32 %v235_v9, %v254_v19 }
  0xed   : > { %429 = vpow2.f32 %v243_v15 }
  0xee   : > { %v257_v22 = vmul.f32 1.442695, %v255_v20  ;;  %v259_v23 = vmul.f32 1.442695, %v256_v21 }
  0xf0   : > { %431 = vpow2.f32 %v257_v22 }
  0xf1   : > { %433 = vpow2.f32 %v259_v23 }
  0xf6   : > { %v428_v16 = vpop.eup %427 }
  0xf7   : > { %v430_v17 = vpop.eup %429 }
  0xf8   : > { %v245_v18 = vadd.f32 %v430_v17, %v428_v16 }
  0xfa   : > { %246 = vadd.xlane.f32.xlu1 %v245_v18  ;;  %v432_v24 = vpop.eup %431 }
  0xfb   : > { %v434_v25 = vpop.eup %433 }
  0xfc   : > { %v261_v26 = vadd.f32 %v434_v25, %v432_v24 }
  0xfe   : > { %262 = vadd.xlane.f32.xlu1 %v261_v26 }
 0x187   : > { %v247_v27 = vpop.xlane.xlu1 %246 }
 0x188   : > { %435 = vlog2.f32 %v247_v27 }
 0x18b   : > { %v263_v37 = vpop.xlane.xlu1 %262 }
 0x18c   : > { %437 = vlog2.f32 %v263_v37 }
 0x18d   : > { %439 = vrcp.f32 %v263_v37 }
 0x192   : > { %v436_v28 = vpop.eup %435 }
 0x193   : > { %v249_v29 = vmul.f32 0.6931472, %v436_v28 }
 0x195   : > { %v250_v30 = vsub.f32 %v239_v12, %v249_v29  ;;  %v251_v31 = vsub.f32 %v240_v13, %v249_v29 }
 0x196   : > { %v438_v38 = vpop.eup %437 }
 0x197   : > { %v264_v32 = vsub.f32 %v255_v20, %v250_v30  ;;  %v265_v33 = vsub.f32 %v256_v21, %v251_v31  ;;  %v440_v39 = vpop.eup %439  ;;  %v274_v40 = vmul.f32 0.6931472, %v438_v38 }
 0x199   : > { %v266_v34 = vmul.f32 %v432_v24, %v264_v32  ;;  %v267_v35 = vmul.f32 %v434_v25, %v265_v33 }
 0x19b   : > { %v268_v36 = vadd.f32 %v267_v35, %v266_v34 }
 0x19d   : > { %269 = vadd.xlane.f32.xlu0 %v268_v36 }
 0x22a   : > { %v270_v41 = vpop.xlane.xlu0 %269 }
 0x22b   : > { %v272_v42 = vmul.f32 %v440_v39, %v270_v41 }
 0x22d   : > { %v275_v43 = vsub.f32 %v272_v42, %v274_v40 }
 0x22f   : > { %277 = vst.msk [vmem:[%s225_s6] sm:$0xff] %vm276_vm0, %v275_v43 }
 0x230 PF: > { %p17_p8 = scmp.ge.s32.totalorder %s588_s18, 4   ;;  %s732_s14 = smov %s531_s15 }
 0x231   : > { %s733_s15 = smov %s535_s16  ;;  %s734_s16 = smov %s598_s21 }
 0x232   : > { %s735_s17 = smov %s588_s18  ;;  %19 = sbr.rel (!%p17_p8) target bundleno = 7 (0x7), region = 85 }
 0x239   :  { %297 = vsyncpa [#allocation4], 1 }
 0x23a   :  { %299 = vsyncpa [#allocation4 + $0x1], 1 }
 0x23b   :  { %300 = vsyncpa [#allocation6], 1 }
 0x23c   :  { %302 = vsyncpa [#allocation6 + $0x1], 1 }

</bundles_post_ra>
